<compile_context>
chip_gen: v6e
topology: v6e:2x2x1
jax: 0.10.0
libtpu: 0.0.40
codegen_flags: <defaults>
</compile_context>

<pallas_src>
import functools

import jax
import jax.numpy as jnp
from jax.experimental import pallas as pl
from jax.experimental.pallas import tpu as pltpu

_BN_EPS = 1e-5


# ----------------------------------------------------------------------------
# Pallas kernel: one grid step = (batch b, sequence tile t), channels-first.
# ----------------------------------------------------------------------------
def _bottleneck_kernel(x_ref, xh_ref, w1_ref, b1_ref, w2_ref, b2_ref,
                       w3_ref, b3_ref, *rest,
                       has_res_conv, lo_total, tl, mask_tail):
    if has_res_conv:
        wres_ref, bres_ref, o_ref = rest
    else:
        (o_ref,) = rest

    t = pl.program_id(1)

    x_f32 = x_ref[0].astype(jnp.float32)                # (Cin, TL)
    xb = x_f32.astype(jnp.bfloat16)

    # conv1 (1x1, stride folded in wrapper) + folded BN1 + ReLU, fp32 accum.
    h1 = jnp.dot(w1_ref[...], xb, preferred_element_type=jnp.float32)
    h1 = jnp.maximum(h1 + b1_ref[...], 0.0)             # (Cmed, TL) f32

    cmed = h1.shape[0]
    lane = jax.lax.broadcasted_iota(jnp.int32, (cmed, tl), 1)
    if mask_tail:
        # zero h1 at padded columns so they do not leak into valid columns
        # through the k=3 neighbourhood (matches Conv1d zero padding).
        h1 = jnp.where(lane + t * tl < lo_total, h1, 0.0)
    h1 = h1.astype(jnp.bfloat16)

    # halo columns: h1 at global positions t*TL-1 and (t+1)*TL (zero if the
    # position is outside [0, Lo), i.e. the conv's own zero padding).
    xh = xh_ref[0, 0].astype(jnp.bfloat16)               # (Cin, 2)
    h1h = jnp.dot(w1_ref[...], xh, preferred_element_type=jnp.float32)
    h1h = jnp.maximum(h1h + b1_ref[...], 0.0)            # (Cmed, 2)
    h1_left = jnp.where(t * tl - 1 >= 0, h1h[:, 0:1], 0.0).astype(jnp.bfloat16)
    h1_right = jnp.where((t + 1) * tl < lo_total, h1h[:, 1:2], 0.0).astype(jnp.bfloat16)

    # conv2 (k=3, pad=1): lane shifts (+ halo at the tile edges) and three
    # accumulated MXU dots -- no im2col materialization.
    if tl % 128 == 0:
        prev = jnp.where(lane == 0, h1_left, pltpu.roll(h1, 1, axis=1))
        nxt = jnp.where(lane == tl - 1, h1_right, pltpu.roll(h1, tl - 1, axis=1))
    else:
        # sub-128-lane tiles (small demo shapes): concat is cheap and robust.
        prev = jnp.concatenate([h1_left, h1[:, :tl - 1]], axis=1)
        nxt = jnp.concatenate([h1[:, 1:], h1_right], axis=1)

    h2 = jnp.dot(w2_ref[0], prev, preferred_element_type=jnp.float32)
    h2 = h2 + jnp.dot(w2_ref[1], h1, preferred_element_type=jnp.float32)
    h2 = h2 + jnp.dot(w2_ref[2], nxt, preferred_element_type=jnp.float32)
    h2 = jnp.maximum(h2 + b2_ref[...], 0.0).astype(jnp.bfloat16)   # (Cmed, TL)

    # conv3 (1x1) + folded BN3 + ReLU
    h3 = jnp.dot(w3_ref[...], h2, preferred_element_type=jnp.float32)
    h3 = jnp.maximum(h3 + b3_ref[...], 0.0)              # (Cout, TL) f32

    # residual branch (no BN in the module); identity path uses fp32 x exactly.
    if has_res_conv:
        res = jnp.dot(wres_ref[...], xb, preferred_element_type=jnp.float32)
        res = res + bres_ref[...]
    else:
        res = x_f32

    # Module order: relu(main) + residual (no ReLU after the add).
    o_ref[0] = (h3 + res).astype(o_ref.dtype)


# ----------------------------------------------------------------------------
# Host-side prep: fold eval-mode BN into bf16 matmul weights + fp32 biases.
# ----------------------------------------------------------------------------
def _fold_bn(conv_bias, bn):
    gamma, beta, mean, var = bn
    scale = gamma / jnp.sqrt(var + _BN_EPS)
    bias = (conv_bias - mean) * scale + beta
    return scale, bias


def _prepare(params):
    s1, b1 = _fold_bn(params["b1"], params["bn1"])
    s2, b2 = _fold_bn(params["b2"], params["bn2"])
    s3, b3 = _fold_bn(params["b3"], params["bn3"])
    # PyTorch conv weight layout is (Cout, Cin, k); channels-first matmul
    # wants exactly (Cout, Cin), so no transpose is needed.
    w1 = params["w1"][:, :, 0] * s1[:, None]                         # (Cmed, Cin)
    w2 = jnp.stack([params["w2"][:, :, t] * s2[:, None] for t in range(3)], 0)
    w3 = params["w3"][:, :, 0] * s3[:, None]                         # (Cout, Cmed)
    prep = {
        "w1": w1.astype(jnp.bfloat16), "b1": b1.reshape(-1, 1).astype(jnp.float32),
        "w2": w2.astype(jnp.bfloat16), "b2": b2.reshape(-1, 1).astype(jnp.float32),
        "w3": w3.astype(jnp.bfloat16), "b3": b3.reshape(-1, 1).astype(jnp.float32),
    }
    if params["res_w"] is not None:
        prep["wres"] = params["res_w"][:, :, 0].astype(jnp.bfloat16)  # (Cout, Cin)
        prep["bres"] = params["res_b"].reshape(-1, 1).astype(jnp.float32)
    else:
        prep["wres"], prep["bres"] = None, None
    return prep


# ----------------------------------------------------------------------------
# Forward wrapper (PyTorch NCL in / NCL out, no layout transposes)
# ----------------------------------------------------------------------------
def bottleneck_forward(x_ncl, params, *, stride, out_dtype=jnp.bfloat16, tl_max=512):
    """x_ncl: (B, Cin, L) as in PyTorch. Returns (B, Cout, Lo) in `out_dtype`."""
    prep = _prepare(params)
    has_res = prep["wres"] is not None
    out_dtype = jnp.dtype(out_dtype)

    B, Cin, L = x_ncl.shape
    Cmed = prep["w1"].shape[0]
    Cout = prep["w3"].shape[0]

    # k=1, stride-s conv == column subsampling (see TODO above).
    x_s = x_ncl[:, :, ::stride] if stride > 1 else x_ncl
    Lo = x_s.shape[-1]
    if not has_res:
        assert Cin == Cout and stride == 1, "identity shortcut requires matching shapes"

    # ---- sequence tiling ----------------------------------------------------
    TL = Lo if Lo <= tl_max else tl_max
    nlo = pl.cdiv(Lo, TL)
    Lo_pad = nlo * TL
    mask_tail = Lo_pad != Lo
    if mask_tail:
        x_s = jnp.pad(x_s, ((0, 0), (0, 0), (0, Lo_pad - Lo)))

    # 2-column halo per tile so the k=3 conv is exact across tile boundaries.
    zero_col = jnp.zeros((B, Cin, 1), x_s.dtype)
    if nlo > 1:
        lefts = x_s[:, :, TL - 1:Lo_pad - 1:TL]    # x[t*TL - 1]  for t = 1..nlo-1
        rights = x_s[:, :, TL:Lo_pad:TL]           # x[(t+1)*TL]  for t = 0..nlo-2
        halo_l = jnp.concatenate([zero_col, lefts], axis=2)
        halo_r = jnp.concatenate([rights, zero_col], axis=2)
    else:
        halo_l, halo_r = zero_col, zero_col
    x_halo = jnp.transpose(jnp.stack([halo_l, halo_r], axis=3), (0, 2, 1, 3))  # (B,nlo,Cin,2)

    def const_spec(shape):
        return pl.BlockSpec(shape, lambda b, t, _n=len(shape): (0,) * _n)

    in_specs = [
        pl.BlockSpec((1, Cin, TL), lambda b, t: (b, 0, t)),
        pl.BlockSpec((1, 1, Cin, 2), lambda b, t: (b, t, 0, 0)),
        const_spec((Cmed, Cin)), const_spec((Cmed, 1)),
        const_spec((3, Cmed, Cmed)), const_spec((Cmed, 1)),
        const_spec((Cout, Cmed)), const_spec((Cout, 1)),
    ]
    args = [x_s, x_halo, prep["w1"], prep["b1"], prep["w2"], prep["b2"],
            prep["w3"], prep["b3"]]
    if has_res:
        in_specs += [const_spec((Cout, Cin)), const_spec((Cout, 1))]
        args += [prep["wres"], prep["bres"]]

    flops = 2 * B * Lo_pad * (Cin * Cmed + 3 * Cmed * Cmed + Cmed * Cout
                              + (Cin * Cout if has_res else 0))
    bytes_accessed = (sum(int(a.size) * a.dtype.itemsize for a in args)
                      + B * Lo_pad * Cout * out_dtype.itemsize)

    # VMEM budget derived from the tile sizes (double-buffered blocks + f32/bf16
    # temporaries + slack) so it stays inside v7x's 64 MiB/TC.
    blk = (Cin * TL * x_s.dtype.itemsize + Cin * 2 * x_s.dtype.itemsize
           + Cout * TL * out_dtype.itemsize
           + sum(int(a.size) * a.dtype.itemsize for a in args[2:]))
    interm = TL * (16 * Cmed + 12 * Cout + 6 * Cin)
    vmem_limit = int(min(64 << 20, max(2 * blk + interm + (2 << 20), 8 << 20)))

    kernel = functools.partial(_bottleneck_kernel, has_res_conv=has_res,
                               lo_total=Lo, tl=TL, mask_tail=mask_tail)

    out = pl.pallas_call(
        kernel,
        out_shape=jax.ShapeDtypeStruct((B, Cout, Lo_pad), out_dtype),
        grid=(B, nlo),
        in_specs=in_specs,
        out_specs=pl.BlockSpec((1, Cout, TL), lambda b, t: (b, 0, t)),
        compiler_params=pltpu.CompilerParams(
            dimension_semantics=("parallel", "parallel"),
            vmem_limit_bytes=vmem_limit),
        cost_estimate=pl.CostEstimate(flops=flops, transcendentals=0,
                                      bytes_accessed=bytes_accessed),
    )(*args)
    return out[:, :, :Lo] if mask_tail else out


# ----------------------------------------------------------------------------
# References for self-checking
# ----------------------------------------------------------------------------
def reference_matched(x_ncl, params, *, stride, out_dtype=jnp.bfloat16):
    """Plain-JAX reference with the same folding / bf16 casts as the kernel."""
    prep = _prepare(params)
    x_s = x_ncl[:, :, ::stride] if stride > 1 else x_ncl          # (B, Cin, Lo)
    xb = x_s.astype(jnp.bfloat16)

    def dot(w, a):   # (Co, Ci) x (B, Ci, L) -> (B, Co, L), fp32 accumulation
        return jnp.einsum("oc,bcl->bol", w, a, preferred_element_type=jnp.float32)

    h1 = jnp.maximum(dot(prep["w1"], xb) + prep["b1"][None], 0.0).astype(jnp.bfloat16)
    B, cm, _ = h1.shape
    zero = jnp.zeros((B, cm, 1), jnp.bfloat16)
    prev = jnp.concatenate([zero, h1[:, :, :-1]], axis=2)
    nxt = jnp.concatenate([h1[:, :, 1:], zero], axis=2)
    h2 = (dot(prep["w2"][0], prev) + dot(prep["w2"][1], h1) + dot(prep["w2"][2], nxt))
    h2 = jnp.maximum(h2 + prep["b2"][None], 0.0).astype(jnp.bfloat16)
    h3 = jnp.maximum(dot(prep["w3"], h2) + prep["b3"][None], 0.0)
    if prep["wres"] is not None:
        res = dot(prep["wres"], xb) + prep["bres"][None]
    else:
        res = x_s.astype(jnp.float32)
    return (h3 + res).astype(out_dtype)


def reference_fp32(x_ncl, params, *, stride):
    """Unfolded fp32 reference following the PyTorch ops (eval-mode BN)."""
    def bn(z, bnp):   # z: (B, C, L)
        g, b, m, v = bnp
        return ((z - m[None, :, None]) / jnp.sqrt(v + _BN_EPS)[None, :, None]
                * g[None, :, None] + b[None, :, None])

    x = x_ncl.astype(jnp.float32)
    xs = x[:, :, ::stride] if stride > 1 else x
    h = jnp.einsum("oc,bcl->bol", params["w1"][:, :, 0], xs) + params["b1"][None, :, None]
    h = jax.nn.relu(bn(h, params["bn1"]))
    hp = jnp.pad(h, ((0, 0), (0, 0), (1, 1)))
    L = h.shape[2]
    h2 = params["b2"][None, :, None] + sum(
        jnp.einsum("oc,bcl->bol", params["w2"][:, :, t], hp[:, :, t:t + L])
        for t in range(3))
    h2 = jax.nn.relu(bn(h2, params["bn2"]))
    h3 = jnp.einsum("oc,bcl->bol", params["w3"][:, :, 0], h2) + params["b3"][None, :, None]
    h3 = jax.nn.relu(bn(h3, params["bn3"]))
    if params["res_w"] is not None:
        res = (jnp.einsum("oc,bcl->bol", params["res_w"][:, :, 0], xs)
               + params["res_b"][None, :, None])
    else:
        res = xs
    return h3 + res


# ----------------------------------------------------------------------------
# Deterministic parameter init (same shapes as the PyTorch module)
# ----------------------------------------------------------------------------
def init_params(key, cin, cmed, cout):
    ks = jax.random.split(key, 7)

    def conv(k, co, ci, ksz):
        kw, kb = jax.random.split(k)
        w = jax.random.normal(kw, (co, ci, ksz), jnp.float32) / (ci * ksz) ** 0.5
        b = jax.random.normal(kb, (co,), jnp.float32) * 0.02
        return w, b

    def bn(k, c):  # (gamma, beta, running_mean, running_var)
        kg, kb, km, kv = jax.random.split(k, 4)
        return (1.0 + 0.1 * jax.random.normal(kg, (c,), jnp.float32),
                0.1 * jax.random.normal(kb, (c,), jnp.float32),
                0.1 * jax.random.normal(km, (c,), jnp.float32),
                0.5 + jax.random.uniform(kv, (c,), jnp.float32))

    p = {}
    p["w1"], p["b1"] = conv(ks[0], cmed, cin, 1); p["bn1"] = bn(ks[1], cmed)
    p["w2"], p["b2"] = conv(ks[2], cmed, cmed, 3); p["bn2"] = bn(ks[3], cmed)
    p["w3"], p["b3"] = conv(ks[4], cout, cmed, 1); p["bn3"] = bn(ks[5], cout)
    if cin != cout:
        p["res_w"], p["res_b"] = conv(ks[6], cout, cin, 1)
    else:
        p["res_w"], p["res_b"] = None, None
    return p


if __name__ == "__main__":
    key = jax.random.PRNGKey(0)
    kx, kp1, kp2, kp3 = jax.random.split(key, 4)

    configs = [  # (Cin, Cmed, Cout, downsample, L, tl_max, param_key)
        (64, 32, 128, True, 16, 512, kp1),    # conv shortcut + stride 2, single tile
        (128, 32, 128, False, 16, 512, kp2),  # identity shortcut, stride 1
        (64, 32, 128, False, 300, 128, kp3),  # multi-tile: halo + ragged tail
    ]

    B = 2
    for cin, cmed, cout, down, L, tl_max, kp in configs:
        stride = 2 if down else 1
        x = jax.random.normal(kx, (B, cin, L), jnp.float32)   # NCL like PyTorch
        params = init_params(kp, cin, cmed, cout)

        fwd = jax.jit(functools.partial(bottleneck_forward, stride=stride,
                                        tl_max=tl_max))
        out = jax.block_until_ready(fwd(x, params))

        lo = (L - 1) // stride + 1
        assert out.shape == (B, cout, lo), out.shape
        out_f = out.astype(jnp.float32)
        assert bool(jnp.all(jnp.isfinite(out_f)))

        ref_m = reference_matched(x, params, stride=stride).astype(jnp.float32)
        assert bool(jnp.allclose(out_f, ref_m, rtol=3e-2, atol=8e-2)), (
            "matched-precision mismatch", float(jnp.max(jnp.abs(out_f - ref_m))))

        ref_f = reference_fp32(x, params, stride=stride)
        assert bool(jnp.allclose(out_f, ref_f, rtol=8e-2, atol=3e-1)), (
            "fp32 mismatch", float(jnp.max(jnp.abs(out_f - ref_f))))

    print("KERNEL_OK")
</pallas_src>

<mosaic_0001>
module attributes {stable_mosaic.version = 11 : i64} {
  func.func @_bottleneck_kernel(%arg0: i32, %arg1: i32, %arg2: memref<1x64x8xf32, #tpu.memory_space<vmem>>, %arg3: memref<1x1x64x2xf32, #tpu.memory_space<vmem>>, %arg4: memref<32x64xbf16, #tpu.memory_space<vmem>>, %arg5: memref<32x1xf32, #tpu.memory_space<vmem>>, %arg6: memref<3x32x32xbf16, #tpu.memory_space<vmem>>, %arg7: memref<32x1xf32, #tpu.memory_space<vmem>>, %arg8: memref<128x32xbf16, #tpu.memory_space<vmem>>, %arg9: memref<128x1xf32, #tpu.memory_space<vmem>>, %arg10: memref<128x64xbf16, #tpu.memory_space<vmem>>, %arg11: memref<128x1xf32, #tpu.memory_space<vmem>>, %arg12: memref<1x128x8xbf16, #tpu.memory_space<vmem>>) attributes {dimension_semantics = [#tpu.dimension_semantics<parallel>, #tpu.dimension_semantics<parallel>], iteration_bounds = array<i64: 2, 1>, scalar_prefetch = 0 : i64, scratch_operands = 0 : i64, tpu.core_type = #tpu.core_type<tc>, window_params = [{transform_indices = @transform_0, window_bounds = array<i64: 1, 64, 8>}, {transform_indices = @transform_1, window_bounds = array<i64: 1, 1, 64, 2>}, {pipeline_mode = #tpu.pipeline_mode<synchronous>, transform_indices = @transform_2, window_bounds = array<i64: 32, 64>}, {pipeline_mode = #tpu.pipeline_mode<synchronous>, transform_indices = @transform_3, window_bounds = array<i64: 32, 1>}, {pipeline_mode = #tpu.pipeline_mode<synchronous>, transform_indices = @transform_4, window_bounds = array<i64: 3, 32, 32>}, {pipeline_mode = #tpu.pipeline_mode<synchronous>, transform_indices = @transform_5, window_bounds = array<i64: 32, 1>}, {pipeline_mode = #tpu.pipeline_mode<synchronous>, transform_indices = @transform_6, window_bounds = array<i64: 128, 32>}, {pipeline_mode = #tpu.pipeline_mode<synchronous>, transform_indices = @transform_7, window_bounds = array<i64: 128, 1>}, {pipeline_mode = #tpu.pipeline_mode<synchronous>, transform_indices = @transform_8, window_bounds = array<i64: 128, 64>}, {pipeline_mode = #tpu.pipeline_mode<synchronous>, transform_indices = @transform_9, window_bounds = array<i64: 128, 1>}, {transform_indices = @transform_10, window_bounds = array<i64: 1, 128, 8>}]} {
    %c0 = arith.constant 0 : index
    %c0_0 = arith.constant 0 : index
    %c0_1 = arith.constant 0 : index
    %0 = vector.load %arg2[%c0, %c0_0, %c0_1] : memref<1x64x8xf32, #tpu.memory_space<vmem>>, vector<1x64x8xf32>
    %1 = vector.shape_cast %0 : vector<1x64x8xf32> to vector<64x8xf32>
    %2 = arith.truncf %1 : vector<64x8xf32> to vector<64x8xbf16>
    %c0_2 = arith.constant 0 : index
    %c0_3 = arith.constant 0 : index
    %3 = vector.load %arg4[%c0_2, %c0_3] : memref<32x64xbf16, #tpu.memory_space<vmem>>, vector<32x64xbf16>
    %cst = arith.constant dense<0.000000e+00> : vector<32x8xf32>
    %4 = tpu.matmul %3, %2, %cst {dimension_numbers = #tpu.dot_dimension_numbers<[1], [0], [0], [1], [0, 0, 1, 1], [], []>} : vector<32x64xbf16>, vector<64x8xbf16>, vector<32x8xf32> -> vector<32x8xf32>
    %c0_4 = arith.constant 0 : index
    %c0_5 = arith.constant 0 : index
    %5 = vector.load %arg5[%c0_4, %c0_5] : memref<32x1xf32, #tpu.memory_space<vmem>>, vector<32x1xf32>
    %6 = vector.broadcast %5 : vector<32x1xf32> to vector<32x8xf32>
    %7 = arith.addf %4, %6 : vector<32x8xf32>
    %cst_6 = arith.constant 0.000000e+00 : f32
    %8 = vector.broadcast %cst_6 : f32 to vector<32x8xf32>
    %9 = arith.maximumf %7, %8 : vector<32x8xf32>
    %10 = arith.truncf %9 : vector<32x8xf32> to vector<32x8xbf16>
    %c0_7 = arith.constant 0 : index
    %c0_8 = arith.constant 0 : index
    %c0_9 = arith.constant 0 : index
    %c0_10 = arith.constant 0 : index
    %11 = vector.load %arg3[%c0_7, %c0_8, %c0_9, %c0_10] : memref<1x1x64x2xf32, #tpu.memory_space<vmem>>, vector<1x1x64x2xf32>
    %12 = vector.shape_cast %11 : vector<1x1x64x2xf32> to vector<64x2xf32>
    %13 = arith.truncf %12 : vector<64x2xf32> to vector<64x2xbf16>
    %c0_11 = arith.constant 0 : index
    %c0_12 = arith.constant 0 : index
    %14 = vector.load %arg4[%c0_11, %c0_12] : memref<32x64xbf16, #tpu.memory_space<vmem>>, vector<32x64xbf16>
    %cst_13 = arith.constant dense<0.000000e+00> : vector<32x2xf32>
    %15 = tpu.matmul %14, %13, %cst_13 {dimension_numbers = #tpu.dot_dimension_numbers<[1], [0], [0], [1], [0, 0, 1, 1], [], []>} : vector<32x64xbf16>, vector<64x2xbf16>, vector<32x2xf32> -> vector<32x2xf32>
    %c0_14 = arith.constant 0 : index
    %c0_15 = arith.constant 0 : index
    %16 = vector.load %arg5[%c0_14, %c0_15] : memref<32x1xf32, #tpu.memory_space<vmem>>, vector<32x1xf32>
    %17 = vector.broadcast %16 : vector<32x1xf32> to vector<32x2xf32>
    %18 = arith.addf %15, %17 : vector<32x2xf32>
    %cst_16 = arith.constant 0.000000e+00 : f32
    %19 = vector.broadcast %cst_16 : f32 to vector<32x2xf32>
    %20 = arith.maximumf %18, %19 : vector<32x2xf32>
    %c8_i32 = arith.constant 8 : i32
    %21 = arith.muli %arg1, %c8_i32 : i32
    %c1_i32 = arith.constant 1 : i32
    %22 = arith.subi %21, %c1_i32 : i32
    %c0_i32 = arith.constant 0 : i32
    %23 = arith.cmpi sge, %22, %c0_i32 : i32
    %24 = vector.extract_strided_slice %20 {offsets = [0, 0], sizes = [32, 1], strides = [1, 1]} : vector<32x2xf32> to vector<32x1xf32>
    %cst_17 = arith.constant 0.000000e+00 : f32
    %25 = vector.broadcast %cst_17 : f32 to vector<32x1xf32>
    %26 = arith.select %23, %24, %25 : vector<32x1xf32>
    %27 = arith.truncf %26 : vector<32x1xf32> to vector<32x1xbf16>
    %c1_i32_18 = arith.constant 1 : i32
    %28 = arith.addi %arg1, %c1_i32_18 : i32
    %c8_i32_19 = arith.constant 8 : i32
    %29 = arith.muli %28, %c8_i32_19 : i32
    %c8_i32_20 = arith.constant 8 : i32
    %30 = arith.cmpi slt, %29, %c8_i32_20 : i32
    %31 = vector.extract_strided_slice %20 {offsets = [0, 1], sizes = [32, 1], strides = [1, 1]} : vector<32x2xf32> to vector<32x1xf32>
    %cst_21 = arith.constant 0.000000e+00 : f32
    %32 = vector.broadcast %cst_21 : f32 to vector<32x1xf32>
    %33 = arith.select %30, %31, %32 : vector<32x1xf32>
    %34 = arith.truncf %33 : vector<32x1xf32> to vector<32x1xbf16>
    %35 = vector.extract_strided_slice %10 {offsets = [0, 0], sizes = [32, 7], strides = [1, 1]} : vector<32x8xbf16> to vector<32x7xbf16>
    %36 = tpu.concatenate %27, %35 in 1 : vector<32x1xbf16>, vector<32x7xbf16> -> vector<32x8xbf16>
    %37 = vector.extract_strided_slice %10 {offsets = [0, 1], sizes = [32, 7], strides = [1, 1]} : vector<32x8xbf16> to vector<32x7xbf16>
    %38 = tpu.concatenate %37, %34 in 1 : vector<32x7xbf16>, vector<32x1xbf16> -> vector<32x8xbf16>
    %c0_22 = arith.constant 0 : index
    %c0_23 = arith.constant 0 : index
    %c0_24 = arith.constant 0 : index
    %39 = vector.load %arg6[%c0_22, %c0_23, %c0_24] : memref<3x32x32xbf16, #tpu.memory_space<vmem>>, vector<1x32x32xbf16>
    %40 = vector.shape_cast %39 : vector<1x32x32xbf16> to vector<32x32xbf16>
    %cst_25 = arith.constant dense<0.000000e+00> : vector<32x8xf32>
    %41 = tpu.matmul %40, %36, %cst_25 {dimension_numbers = #tpu.dot_dimension_numbers<[1], [0], [0], [1], [0, 0, 1, 1], [], []>} : vector<32x32xbf16>, vector<32x8xbf16>, vector<32x8xf32> -> vector<32x8xf32>
    %c1 = arith.constant 1 : index
    %c0_26 = arith.constant 0 : index
    %c0_27 = arith.constant 0 : index
    %42 = vector.load %arg6[%c1, %c0_26, %c0_27] : memref<3x32x32xbf16, #tpu.memory_space<vmem>>, vector<1x32x32xbf16>
    %43 = vector.shape_cast %42 : vector<1x32x32xbf16> to vector<32x32xbf16>
    %cst_28 = arith.constant dense<0.000000e+00> : vector<32x8xf32>
    %44 = tpu.matmul %43, %10, %cst_28 {dimension_numbers = #tpu.dot_dimension_numbers<[1], [0], [0], [1], [0, 0, 1, 1], [], []>} : vector<32x32xbf16>, vector<32x8xbf16>, vector<32x8xf32> -> vector<32x8xf32>
    %45 = arith.addf %41, %44 : vector<32x8xf32>
    %c2 = arith.constant 2 : index
    %c0_29 = arith.constant 0 : index
    %c0_30 = arith.constant 0 : index
    %46 = vector.load %arg6[%c2, %c0_29, %c0_30] : memref<3x32x32xbf16, #tpu.memory_space<vmem>>, vector<1x32x32xbf16>
    %47 = vector.shape_cast %46 : vector<1x32x32xbf16> to vector<32x32xbf16>
    %cst_31 = arith.constant dense<0.000000e+00> : vector<32x8xf32>
    %48 = tpu.matmul %47, %38, %cst_31 {dimension_numbers = #tpu.dot_dimension_numbers<[1], [0], [0], [1], [0, 0, 1, 1], [], []>} : vector<32x32xbf16>, vector<32x8xbf16>, vector<32x8xf32> -> vector<32x8xf32>
    %49 = arith.addf %45, %48 : vector<32x8xf32>
    %c0_32 = arith.constant 0 : index
    %c0_33 = arith.constant 0 : index
    %50 = vector.load %arg7[%c0_32, %c0_33] : memref<32x1xf32, #tpu.memory_space<vmem>>, vector<32x1xf32>
    %51 = vector.broadcast %50 : vector<32x1xf32> to vector<32x8xf32>
    %52 = arith.addf %49, %51 : vector<32x8xf32>
    %cst_34 = arith.constant 0.000000e+00 : f32
    %53 = vector.broadcast %cst_34 : f32 to vector<32x8xf32>
    %54 = arith.maximumf %52, %53 : vector<32x8xf32>
    %55 = arith.truncf %54 : vector<32x8xf32> to vector<32x8xbf16>
    %c0_35 = arith.constant 0 : index
    %c0_36 = arith.constant 0 : index
    %56 = vector.load %arg8[%c0_35, %c0_36] : memref<128x32xbf16, #tpu.memory_space<vmem>>, vector<128x32xbf16>
    %cst_37 = arith.constant dense<0.000000e+00> : vector<128x8xf32>
    %57 = tpu.matmul %56, %55, %cst_37 {dimension_numbers = #tpu.dot_dimension_numbers<[1], [0], [0], [1], [0, 0, 1, 1], [], []>} : vector<128x32xbf16>, vector<32x8xbf16>, vector<128x8xf32> -> vector<128x8xf32>
    %c0_38 = arith.constant 0 : index
    %c0_39 = arith.constant 0 : index
    %58 = vector.load %arg9[%c0_38, %c0_39] : memref<128x1xf32, #tpu.memory_space<vmem>>, vector<128x1xf32>
    %59 = vector.broadcast %58 : vector<128x1xf32> to vector<128x8xf32>
    %60 = arith.addf %57, %59 : vector<128x8xf32>
    %cst_40 = arith.constant 0.000000e+00 : f32
    %61 = vector.broadcast %cst_40 : f32 to vector<128x8xf32>
    %62 = arith.maximumf %60, %61 : vector<128x8xf32>
    %c0_41 = arith.constant 0 : index
    %c0_42 = arith.constant 0 : index
    %63 = vector.load %arg10[%c0_41, %c0_42] : memref<128x64xbf16, #tpu.memory_space<vmem>>, vector<128x64xbf16>
    %cst_43 = arith.constant dense<0.000000e+00> : vector<128x8xf32>
    %64 = tpu.matmul %63, %2, %cst_43 {dimension_numbers = #tpu.dot_dimension_numbers<[1], [0], [0], [1], [0, 0, 1, 1], [], []>} : vector<128x64xbf16>, vector<64x8xbf16>, vector<128x8xf32> -> vector<128x8xf32>
    %c0_44 = arith.constant 0 : index
    %c0_45 = arith.constant 0 : index
    %65 = vector.load %arg11[%c0_44, %c0_45] : memref<128x1xf32, #tpu.memory_space<vmem>>, vector<128x1xf32>
    %66 = vector.broadcast %65 : vector<128x1xf32> to vector<128x8xf32>
    %67 = arith.addf %64, %66 : vector<128x8xf32>
    %68 = arith.addf %62, %67 : vector<128x8xf32>
    %69 = arith.truncf %68 : vector<128x8xf32> to vector<128x8xbf16>
    %c0_46 = arith.constant 0 : index
    %c0_47 = arith.constant 0 : index
    %c0_48 = arith.constant 0 : index
    %70 = vector.load %arg12[%c0_46, %c0_47, %c0_48] : memref<1x128x8xbf16, #tpu.memory_space<vmem>>, vector<1x128x8xbf16>
    %71 = vector.shape_cast %70 : vector<1x128x8xbf16> to vector<128x8xbf16>
    %72 = vector.shape_cast %69 : vector<128x8xbf16> to vector<1x128x8xbf16>
    tpu.vector_store %arg12[%c0_46, %c0_47, %c0_48], %72 {strides = array<i32>} : memref<1x128x8xbf16, #tpu.memory_space<vmem>>, vector<1x128x8xbf16>,
    return
  }
  func.func @transform_0(%arg0: i32, %arg1: i32) -> (i32, i32, i32) {
    %c0_i32 = arith.constant 0 : i32
    %c0_i32_0 = arith.constant 0 : i32
    return %arg0, %c0_i32, %arg1 : i32, i32, i32
  }
  func.func @transform_1(%arg0: i32, %arg1: i32) -> (i32, i32, i32, i32) {
    %c0_i32 = arith.constant 0 : i32
    %c0_i32_0 = arith.constant 0 : i32
    %c0_i32_1 = arith.constant 0 : i32
    return %arg0, %arg1, %c0_i32, %c0_i32_0 : i32, i32, i32, i32
  }
  func.func @transform_2(%arg0: i32, %arg1: i32) -> (i32, i32) {
    %c0_i32 = arith.constant 0 : i32
    %c0_i32_0 = arith.constant 0 : i32
    %c0_i32_1 = arith.constant 0 : i32
    return %c0_i32, %c0_i32_0 : i32, i32
  }
  func.func @transform_3(%arg0: i32, %arg1: i32) -> (i32, i32) {
    %c0_i32 = arith.constant 0 : i32
    %c0_i32_0 = arith.constant 0 : i32
    %c0_i32_1 = arith.constant 0 : i32
    return %c0_i32, %c0_i32_0 : i32, i32
  }
  func.func @transform_4(%arg0: i32, %arg1: i32) -> (i32, i32, i32) {
    %c0_i32 = arith.constant 0 : i32
    %c0_i32_0 = arith.constant 0 : i32
    %c0_i32_1 = arith.constant 0 : i32
    %c0_i32_2 = arith.constant 0 : i32
    return %c0_i32, %c0_i32_0, %c0_i32_1 : i32, i32, i32
  }
  func.func @transform_5(%arg0: i32, %arg1: i32) -> (i32, i32) {
    %c0_i32 = arith.constant 0 : i32
    %c0_i32_0 = arith.constant 0 : i32
    %c0_i32_1 = arith.constant 0 : i32
    return %c0_i32, %c0_i32_0 : i32, i32
  }
  func.func @transform_6(%arg0: i32, %arg1: i32) -> (i32, i32) {
    %c0_i32 = arith.constant 0 : i32
    %c0_i32_0 = arith.constant 0 : i32
    %c0_i32_1 = arith.constant 0 : i32
    return %c0_i32, %c0_i32_0 : i32, i32
  }
  func.func @transform_7(%arg0: i32, %arg1: i32) -> (i32, i32) {
    %c0_i32 = arith.constant 0 : i32
    %c0_i32_0 = arith.constant 0 : i32
    %c0_i32_1 = arith.constant 0 : i32
    return %c0_i32, %c0_i32_0 : i32, i32
  }
  func.func @transform_8(%arg0: i32, %arg1: i32) -> (i32, i32) {
    %c0_i32 = arith.constant 0 : i32
    %c0_i32_0 = arith.constant 0 : i32
    %c0_i32_1 = arith.constant 0 : i32
    return %c0_i32, %c0_i32_0 : i32, i32
  }
  func.func @transform_9(%arg0: i32, %arg1: i32) -> (i32, i32) {
    %c0_i32 = arith.constant 0 : i32
    %c0_i32_0 = arith.constant 0 : i32
    %c0_i32_1 = arith.constant 0 : i32
    return %c0_i32, %c0_i32_0 : i32, i32
  }
  func.func @transform_10(%arg0: i32, %arg1: i32) -> (i32, i32, i32) {
    %c0_i32 = arith.constant 0 : i32
    %c0_i32_0 = arith.constant 0 : i32
    return %arg0, %c0_i32, %arg1 : i32, i32, i32
  }
}

</mosaic_0001>

<bundles_post_ra>
// kernel: bottleneck_forward.1
= control target key start
LH: loop header
LB: loop body
LE: loop exit
PB: predicated region body
PF: predicated region fallthrough
CT: control target
= control target key end

     0   :  { %s2055_s13 = smov 0   ;;  %s2057_s14 = smov 0   ;;  %s2415_s0 = inlined_call_operand.vmem [shape: f32[2,64,8], index: 0, kind: input, shape index: {}]   ;;  %s2416_s1 = inlined_call_operand.vmem [shape: f32[2,1,64,2], index: 1, kind: input, shape index: {}]   ;;  %s2417_s2 = inlined_call_operand.vmem [shape: bf16[32,64], index: 2, kind: input, shape index: {}]   ;;  %s2418_s3 = inlined_call_operand.vmem [shape: f32[32,1], index: 3, kind: input, shape index: {}]   ;;  %s2419_s4 = inlined_call_operand.vmem [shape: bf16[3,32,32], index: 4, kind: input, shape index: {}]   ;;  %s2420_s5 = inlined_call_operand.vmem [shape: f32[32,1], index: 5, kind: input, shape index: {}]   ;;  %s2421_s6 = inlined_call_operand.vmem [shape: bf16[128,32], index: 6, kind: input, shape index: {}]   ;;  %s2422_s7 = inlined_call_operand.vmem [shape: f32[128,1], index: 7, kind: input, shape index: {}]   ;;  %s2423_s8 = inlined_call_operand.vmem [shape: bf16[128,64], index: 8, kind: input, shape index: {}]   ;;  %s2424_s9 = inlined_call_operand.vmem [shape: f32[128,1], index: 9, kind: input, shape index: {}]   ;;  %s2425_s10 = inlined_call_operand.vmem [shape: bf16[2,128,8], index: 10, kind: output, shape index: {}]  }
   0x1   :  { %s2059_s15 = smov 0  }
   0x2 LB: > { %s32_s16 = sadd.s32 1, %s1989_s14  ;;  %p1676_p0 = scmp.ge.s32.totalorder %s1993_s15, 1  ;;  %s1993_s15 = sphi %s2059_s15, %s20_s15   ;;  %s1989_s14 = sphi %s2057_s14, %s2427_s14   ;;  %s1985_s13 = sphi %s2055_s13, %s2426_s13  }
   0x3   : > { %p34_p1 = scmp.ge.s32.totalorder %s32_s16, 2  ;;  %p347_p2 = scmp.lt.s32.totalorder %s1993_s15, 3 }
   0x5   : > { %s2429_s16 = smov (%p34_p1, %s32_s16), 0  ;;  %p348_p3 = pnand %p1676_p0, %p347_p2 }
   0x6   : > { %p400_p4 = scmp.lt.s32.totalorder (!%p348_p3), %s1985_s13, 1  ;;  %s1996_s23 = smov (!%p348_p3), 127  }
   0x7   : > { %351 = sbr.rel (%p348_p3) target bundleno = 811 (0x32b), region = 60  ;;  %s1997_s24 = smov (!%p348_p3), 1  }
   0x8   : > { %s1999_s26 = smov (!%p348_p3), 6  }
   0xc   : > { %v1947_v0 = vld [vmem:[%s2417_s2] sm:$0xff]   ;;  %vm476_vm0 = vcmask 523264   ;;  %s2431_s13 = smov (!%p400_p4, %s1985_s13), 1  ;;  %v444_v1 = vld [vmem:[%s2418_s3 + $0x10] sm:$0xff]  ;;  %v1995_v3 = vmov 0   ;;  %v445_v4 = vld [vmem:[%s2418_s3 + $0x18] sm:$0xff] }
   0xd   : > { %1832 = vmatprep.mubr.msk.bf16.mxu0 %vm476_vm0, %v1947_v0  ;;  %v442_v2 = vld [vmem:[%s2418_s3] sm:$0xff]  ;;  %1844 = vmatprep.mubr.msk.bf16.mxu1 %vm476_vm0, %v1947_v0  ;;  %s2087_s25 = sshll.u32 %s2431_s13, 6  ;;  %v443_v5 = vld [vmem:[%s2418_s3 + $0x8] sm:$0xff]  ;;  %v1949_v31 = vld [vmem:[%s2419_s4 + $0x10] sm:$0xff]   ;;  %vm680_vm1 = vcmask 261120   ;;  %v1998_v51 = vmov 0.0|0.0  }
   0xe   : > { %1945 = vset.pattern.permute.xlu0 %v1995_v3  ;;  %1946 = vset.pattern.permute.xlu1 %v1995_v3  ;;  %s407_s30 = scalar_lea.vmem %s2415_s0, %s2087_s25  ;;  %s2100_s13 = scalar_lea.vmem %s2416_s1, %s2087_s25  ;;  %v1948_v24 = vld [vmem:[%s2417_s2 + $0x8] sm:$0xff]   ;;  %v1953_v46 = vld [vmem:[%s2419_s4 + $0x20] sm:$0xff]   ;;  %v1950_v52 = vld [vmem:[%s2419_s4 + $0x18] sm:$0xff]   ;;  %vm633_vm2 = vcmask 7168   ;;  %vm652_vm3 = vcmask 56320   ;;  %vm1551_vm4 = vcmask 60416  }
   0xf   : > { %458 = vperm.xlu0 %1945, %v444_v1   ;;  %448 = vperm.xlu1 %1946, %v442_v2   ;;  %v432_v6 = vld [vmem:[%s407_s30 + $0x30] sm:$0xff]  ;;  %v433_v7 = vld [vmem:[%s407_s30 + $0x38] sm:$0xff]  ;;  %v430_v8 = vld [vmem:[%s407_s30 + $0x20] sm:$0xff]  ;;  %s2361_s29 = scalar_lea.vmem %s2425_s10, %s2087_s25 }
  0x10   : > { %v2102_v9 = vpack.c.bf16 %v433_v7, %v432_v6  ;;  %v431_v10 = vld [vmem:[%s407_s30 + $0x28] sm:$0xff]  ;;  %v428_v12 = vld [vmem:[%s407_s30 + $0x10] sm:$0xff]  ;;  %v429_v13 = vld [vmem:[%s407_s30 + $0x18] sm:$0xff] }
  0x11   : > { %v2104_v11 = vpack.c.bf16 %v431_v10, %v430_v8  ;;  %v544_v14 = vld [vmem:[%s2100_s13 + $0x30] sm:$0xff]  ;;  %v545_v15 = vld [vmem:[%s2100_s13 + $0x38] sm:$0xff]  ;;  %v542_v16 = vld [vmem:[%s2100_s13 + $0x20] sm:$0xff]  ;;  %v2113_v22 = vpack.c.bf16 %v429_v13, %v428_v12 }
  0x12   : > { %1824 = vmatprep.subr.bf16.mxu0 %v2102_v9  ;;  %v543_v17 = vld [vmem:[%s2100_s13 + $0x28] sm:$0xff]  ;;  %v426_v18 = vld [vmem:[%s407_s30] sm:$0xff]  ;;  %v549_v20 = vpack.c.bf16 %v545_v15, %v544_v14  ;;  %v540_v25 = vld [vmem:[%s2100_s13 + $0x10] sm:$0xff] }
  0x13   : > { %463 = vperm.xlu0 %1945, %v445_v4   ;;  %453 = vperm.xlu1 %1946, %v443_v5   ;;  %v427_v19 = vld [vmem:[%s407_s30 + $0x8] sm:$0xff]  ;;  %v548_v21 = vpack.c.bf16 %v543_v17, %v542_v16  ;;  %v541_v26 = vld [vmem:[%s2100_s13 + $0x18] sm:$0xff]  ;;  %v538_v28 = vld [vmem:[%s2100_s13] sm:$0xff] }
  0x14   : > { %1825 = vmatpush3.bf16.msra.mxu0 %v2102_v9  ;;  %1836 = vmatprep.subr.bf16.mxu1 %v549_v20  ;;  %v2117_v23 = vpack.c.bf16 %v427_v19, %v426_v18  ;;  %v547_v27 = vpack.c.bf16 %v541_v26, %v540_v25  ;;  %v539_v29 = vld [vmem:[%s2100_s13 + $0x8] sm:$0xff]  ;;  %v1951_v53 = vld [vmem:[%s2419_s4] sm:$0xff]   ;;  %v877_v54 = vld [vmem:[%s2420_s5 + $0x10] sm:$0xff] }
  0x15   : > { %1826 = vmatprep.subr.bf16.mxu0 %v2104_v11  ;;  %1837 = vmatpush3.bf16.msra.mxu1 %v549_v20  ;;  %v546_v30 = vpack.c.bf16 %v539_v29, %v538_v28  ;;  %v878_v55 = vld [vmem:[%s2420_s5 + $0x18] sm:$0xff]  ;;  %v875_v56 = vld [vmem:[%s2420_s5] sm:$0xff]  ;;  %v876_v57 = vld [vmem:[%s2420_s5 + $0x8] sm:$0xff] }
  0x16   : > { %1838 = vmatprep.subr.bf16.mxu1 %v548_v21  ;;  %v925_v58 = vld [vmem:[%s2422_s7] sm:$0xff]  ;;  %v926_v59 = vld [vmem:[%s2422_s7 + $0x8] sm:$0xff]  ;;  %v927_v60 = vld [vmem:[%s2422_s7 + $0x10] sm:$0xff] }
  0x17   : > { %v928_v61 = vld [vmem:[%s2422_s7 + $0x18] sm:$0xff]  ;;  %v929_v62 = vld [vmem:[%s2422_s7 + $0x20] sm:$0xff]  ;;  %v930_v63 = vld [vmem:[%s2422_s7 + $0x28] sm:$0xff] }
  0x18   : > { %1827 = vmatpush3.bf16.msra.mxu0 %v2104_v11  ;;  %v931_v0 = vld [vmem:[%s2422_s7 + $0x30] sm:$0xff]  ;;  %v932_v1 = vld [vmem:[%s2422_s7 + $0x38] sm:$0xff]  ;;  %v933_v2 = vld [vmem:[%s2422_s7 + $0x40] sm:$0xff] }
  0x19   : > { %1828 = vmatprep.subr.bf16.mxu0 %v2113_v22  ;;  %1839 = vmatpush3.bf16.msra.mxu1 %v548_v21  ;;  %v934_v3 = vld [vmem:[%s2422_s7 + $0x48] sm:$0xff]  ;;  %v935_v4 = vld [vmem:[%s2422_s7 + $0x50] sm:$0xff]  ;;  %v936_v5 = vld [vmem:[%s2422_s7 + $0x58] sm:$0xff] }
  0x1a   : > { %1840 = vmatprep.subr.bf16.mxu1 %v547_v27  ;;  %v937_v6 = vld [vmem:[%s2422_s7 + $0x60] sm:$0xff]  ;;  %v938_v7 = vld [vmem:[%s2422_s7 + $0x68] sm:$0xff]  ;;  %v939_v8 = vld [vmem:[%s2422_s7 + $0x70] sm:$0xff] }
  0x1b   : > { %v940_v10 = vld [vmem:[%s2422_s7 + $0x78] sm:$0xff]  ;;  %v1214_v12 = vld [vmem:[%s2424_s9] sm:$0xff]  ;;  %v1215_v13 = vld [vmem:[%s2424_s9 + $0x8] sm:$0xff] }
  0x1c   : > { %1829 = vmatpush3.bf16.msra.mxu0 %v2113_v22  ;;  %v1216_v14 = vld [vmem:[%s2424_s9 + $0x10] sm:$0xff]  ;;  %v1217_v15 = vld [vmem:[%s2424_s9 + $0x18] sm:$0xff]  ;;  %v1218_v16 = vld [vmem:[%s2424_s9 + $0x20] sm:$0xff] }
  0x1d   : > { %1830 = vmatprep.subr.bf16.mxu0 %v2117_v23  ;;  %1841 = vmatpush3.bf16.msra.mxu1 %v547_v27  ;;  %v1219_v17 = vld [vmem:[%s2424_s9 + $0x28] sm:$0xff]  ;;  %v1220_v18 = vld [vmem:[%s2424_s9 + $0x30] sm:$0xff]  ;;  %v1221_v19 = vld [vmem:[%s2424_s9 + $0x38] sm:$0xff] }
  0x1e   : > { %1842 = vmatprep.subr.bf16.mxu1 %v546_v30  ;;  %v1222_v21 = vld [vmem:[%s2424_s9 + $0x40] sm:$0xff]  ;;  %v1224_v27 = vld [vmem:[%s2424_s9 + $0x50] sm:$0xff]  ;;  %v1225_v28 = vld [vmem:[%s2424_s9 + $0x58] sm:$0xff] }
  0x20   : > { %1831 = vmatpush3.bf16.msra.mxu0 %v2117_v23 }
  0x21   : > { %1843 = vmatpush3.bf16.msra.mxu1 %v546_v30  ;;  %v1226_v30 = vld [vmem:[%s2424_s9 + $0x60] sm:$0xff] }
  0x23   : > { %1833 = vmatmul.mubr.msk.bf16.vlgmr.msra.gmra.mxu0 %vm476_vm0, %v1948_v24 }
  0x24   : > { %1845 = vmatmul.mubr.msk.bf16.vlgmr.msra.gmra.mxu1 %vm476_vm0, %v1948_v24  ;;  %1868 = vmatprep.mubr.msk.bf16.mxu0 %vm680_vm1, %v1953_v46  ;;  %v1223_v24 = vld [vmem:[%s2424_s9 + $0x48] sm:$0xff]  ;;  %v1955_v46 = vld [vmem:[%s2423_s8] sm:$0xff]  }
  0x25   : > { %1852 = vmatprep.mubr.msk.bf16.mxu1 %vm680_vm1, %v1949_v31  ;;  %v1227_v31 = vld [vmem:[%s2424_s9 + $0x68] sm:$0xff] }
  0x8a   : > { %v459_v32 = vpop.permute.xlu0 %458  ;;  %v449_v33 = vpop.permute.xlu1 %448 }
  0x8e   : > { %v464_v37 = vpop.permute.xlu0 %463  ;;  %v454_v41 = vpop.permute.xlu1 %453 }
  0xe3   : > { %v1834_v34 = vpop.f32.mrf.mxu0 }
  0xe4   : > { %v526_v36 = vadd.f32 %v1834_v34, %v459_v32  ;;  %v1846_v20 = vpop.f32.mrf.mxu1  ;;  %v1228_v32 = vld [vmem:[%s2424_s9 + $0x70] sm:$0xff] }
  0xe5   : > { %v517_v35 = vpop.f32.mrf.mxu0 }
  0xe6   : > { %v518_v39 = vadd.f32 %v517_v35, %v449_v33  ;;  %v534_v43 = vmax.f32 %v526_v36, 0.0  ;;  %v584_v25 = vpop.f32.mrf.mxu1  ;;  %v1229_v33 = vld [vmem:[%s2424_s9 + $0x78] sm:$0xff] }
  0xe7   : > { %v1835_v38 = vpop.f32.mrf.mxu0  ;;  %v1964_v25 = vld [vmem:[%s2421_s6 + $0x8] sm:$0xff]  }
  0xe8   : > { %v529_v40 = vadd.f32 %v1835_v38, %v464_v37  ;;  %v532_v47 = vmax.f32 %v518_v39, 0.0  ;;  %v1847_v26 = vpop.f32.mrf.mxu1 }
  0xe9   : > { %v520_v42 = vpop.f32.mrf.mxu0  ;;  %v1965_v26 = vld [vmem:[%s2421_s6 + $0x10] sm:$0xff]  }
  0xea   : > { %v535_v44 = vmax.f32 %v529_v40, 0.0  ;;  %v521_v45 = vadd.f32 %v520_v42, %v454_v41  ;;  %v587_v29 = vpop.f32.mrf.mxu1  ;;  %v1952_v41 = vld [vmem:[%s2419_s4 + $0x8] sm:$0xff]  }
  0xeb   : > { %v1968_v29 = vld [vmem:[%s2421_s6 + $0x28] sm:$0xff]  }
  0xec   : > { %v537_v48 = vpack.c.bf16 %v535_v44, %v534_v43  ;;  %v533_v49 = vmax.f32 %v521_v45, 0.0  ;;  %v1954_v45 = vld [vmem:[%s2419_s4 + $0x28] sm:$0xff]  }
  0xee   : > { %v536_v50 = vpack.c.bf16 %v533_v49, %v532_v47  ;;  %644 = vrot.lane.b32.xlu1 %v537_v48, %s1996_s23  ;;  %631 = vrot.lane.b32.xlu0 %v537_v48, %s1997_s24  ;;  %v1956_v47 = vld [vmem:[%s2423_s8 + $0x8] sm:$0xff]   ;;  %v1962_v49 = vld [vmem:[%s2423_s8 + $0x38] sm:$0xff]  }
  0xef   : > { %1848 = vmatprep.subr.bf16.mxu1 %v537_v48 }
  0xf0   : > { %1849 = vmatpush3.bf16.msra.mxu1 %v537_v48  ;;  %v1961_v48 = vld [vmem:[%s2423_s8 + $0x30] sm:$0xff]  }
  0xf1   : > { %1850 = vmatprep.subr.bf16.mxu1 %v536_v50 }
  0xf2   : > { %650 = vrot.lane.b32.xlu0 %v1998_v51, %s1999_s26  ;;  %629 = vrot.lane.b32.xlu1 %v536_v50, %s1997_s24 }
  0xf4   : > { %1851 = vmatpush3.bf16.msra.mxu1 %v536_v50 }
  0xf6   : > { %642 = vrot.lane.b32.xlu0 %v536_v50, %s1996_s23  ;;  %648 = vrot.lane.b32.xlu1 %v1998_v51, %s1999_s26  ;;  %v1963_v50 = vld [vmem:[%s2421_s6] sm:$0xff]  }
  0xf7   : > { %1853 = vmatmul.mubr.msk.bf16.vlgmr.msra.gmra.mxu1 %vm680_vm1, %v1950_v52 }
  0xf8   : > { %1860 = vmatprep.mubr.msk.bf16.mxu1 %vm680_vm1, %v1951_v53 }
  0xfa   : > { %891 = vperm.xlu0 %1945, %v877_v54   ;;  %896 = vperm.xlu1 %1946, %v878_v55  }
  0xfe   : > { %881 = vperm.xlu0 %1945, %v875_v56   ;;  %886 = vperm.xlu1 %1946, %v876_v57  }
 0x102   : > { %943 = vperm.xlu0 %1945, %v925_v58   ;;  %948 = vperm.xlu1 %1946, %v926_v59  }
 0x106   : > { %953 = vperm.xlu0 %1945, %v927_v60   ;;  %958 = vperm.xlu1 %1946, %v928_v61  }
 0x10a   : > { %963 = vperm.xlu0 %1945, %v929_v62   ;;  %968 = vperm.xlu1 %1946, %v930_v63  }
 0x10e   : > { %973 = vperm.xlu0 %1945, %v931_v0   ;;  %978 = vperm.xlu1 %1946, %v932_v1  }
 0x112   : > { %983 = vperm.xlu0 %1945, %v933_v2   ;;  %988 = vperm.xlu1 %1946, %v934_v3  }
 0x116   : > { %993 = vperm.xlu0 %1945, %v935_v4   ;;  %998 = vperm.xlu1 %1946, %v936_v5  }
 0x11a   : > { %1003 = vperm.xlu0 %1945, %v937_v6   ;;  %1008 = vperm.xlu1 %1946, %v938_v7  }
 0x11e   : > { %1013 = vperm.xlu0 %1945, %v939_v8   ;;  %1018 = vperm.xlu1 %1946, %v940_v10  }
 0x122   : > { %1232 = vperm.xlu0 %1945, %v1214_v12   ;;  %1237 = vperm.xlu1 %1946, %v1215_v13  }
 0x126   : > { %1242 = vperm.xlu0 %1945, %v1216_v14   ;;  %1247 = vperm.xlu1 %1946, %v1217_v15  }
 0x12a   : > { %1252 = vperm.xlu0 %1945, %v1218_v16   ;;  %1257 = vperm.xlu1 %1946, %v1219_v17  }
 0x12e   : > { %1262 = vperm.xlu0 %1945, %v1220_v18   ;;  %1267 = vperm.xlu1 %1946, %v1221_v19  }
 0x132   : > { %1272 = vperm.xlu0 %1945, %v1222_v21   ;;  %1277 = vperm.xlu1 %1946, %v1223_v24  }
 0x136   : > { %1282 = vperm.xlu0 %1945, %v1224_v27   ;;  %1287 = vperm.xlu1 %1946, %v1225_v28   ;;  %v1966_v27 = vld [vmem:[%s2421_s6 + $0x18] sm:$0xff]   ;;  %v1967_v28 = vld [vmem:[%s2421_s6 + $0x20] sm:$0xff]  }
 0x13a   : > { %1292 = vperm.xlu0 %1945, %v1226_v30   ;;  %1297 = vperm.xlu1 %1946, %v1227_v31   ;;  %v1969_v30 = vld [vmem:[%s2421_s6 + $0x30] sm:$0xff]   ;;  %v1970_v31 = vld [vmem:[%s2421_s6 + $0x38] sm:$0xff]  }
 0x13e   : > { %1302 = vperm.xlu0 %1945, %v1228_v32   ;;  %1307 = vperm.xlu1 %1946, %v1229_v33  }
 0x160   : > { %v645_v34 = vpop.permute.xlu1 %644  ;;  %v632_v35 = vpop.permute.xlu0 %631 }
 0x161   : > { %v640_v36 = vsel %vm633_vm2, 0.0|0.0, %v632_v35 }
 0x162   : > { %1856 = vmatprep.subr.bf16.mxu1 %v640_v36 }
 0x163   : > { %1857 = vmatpush3.bf16.msra.mxu1 %v640_v36 }
 0x164   : > { %v651_v37 = vpop.permute.xlu0 %650  ;;  %v630_v38 = vpop.permute.xlu1 %629 }
 0x165   : > { %v636_v39 = vsel %vm633_vm2, 0.0|0.0, %v630_v38  ;;  %v659_v40 = vsel %vm652_vm3, %v645_v34, %v651_v37 }
 0x166   : > { %1858 = vmatprep.subr.bf16.mxu1 %v636_v39  ;;  %1864 = vmatprep.subr.bf16.mxu0 %v659_v40 }
 0x167   : > { %1859 = vmatpush3.bf16.msra.mxu1 %v636_v39  ;;  %1865 = vmatpush3.bf16.msra.mxu0 %v659_v40 }
 0x168   : > { %v643_v42 = vpop.permute.xlu0 %642  ;;  %v649_v43 = vpop.permute.xlu1 %648 }
 0x169   : > { %v655_v44 = vsel %vm652_vm3, %v643_v42, %v649_v43 }
 0x16a   : > { %1861 = vmatmul.mubr.msk.bf16.vlgmr.msra.gmra.mxu1 %vm680_vm1, %v1952_v41  ;;  %1866 = vmatprep.subr.bf16.mxu0 %v655_v44 }
 0x16b   : > { %1867 = vmatpush3.bf16.msra.mxu0 %v655_v44  ;;  %1876 = vmatprep.mubr.msk.bf16.mxu1 %vm680_vm1, %v1963_v50 }
 0x16c   : > { %1892 = vmatprep.subr.bf16.mxu0 %v2102_v9 }
 0x16e   : > { %1869 = vmatmul.mubr.msk.bf16.vlgmr.msra.gmra.mxu0 %vm680_vm1, %v1954_v45 }
 0x16f   : > { %1893 = vmatpush3.bf16.msra.mxu0 %v2102_v9  ;;  %1900 = vmatprep.mubr.msk.bf16.mxu0 %vm476_vm0, %v1955_v46  ;;  %v1957_v9 = vld [vmem:[%s2423_s8 + $0x10] sm:$0xff]  }
 0x170   : > { %1894 = vmatprep.subr.bf16.mxu0 %v2104_v11 }
 0x173   : > { %1895 = vmatpush3.bf16.msra.mxu0 %v2104_v11  ;;  %v1958_v11 = vld [vmem:[%s2423_s8 + $0x18] sm:$0xff]  }
 0x174   : > { %1896 = vmatprep.subr.bf16.mxu0 %v2113_v22 }
 0x175   : > { %v892_v57 = vpop.permute.xlu0 %891  ;;  %v897_v61 = vpop.permute.xlu1 %896 }
 0x177   : > { %1897 = vmatpush3.bf16.msra.mxu0 %v2113_v22  ;;  %v1959_v22 = vld [vmem:[%s2423_s8 + $0x20] sm:$0xff]  }
 0x178   : > { %1898 = vmatprep.subr.bf16.mxu0 %v2117_v23 }
 0x179   : > { %v882_v8 = vpop.permute.xlu0 %881  ;;  %v887_v15 = vpop.permute.xlu1 %886 }
 0x17b   : > { %1899 = vmatpush3.bf16.msra.mxu0 %v2117_v23  ;;  %v1960_v23 = vld [vmem:[%s2423_s8 + $0x28] sm:$0xff]  }
 0x17d   : > { %v944_v32 = vpop.permute.xlu0 %943  ;;  %v949_v33 = vpop.permute.xlu1 %948 }
 0x17e   : > { %1901 = vmatmul.mubr.msk.bf16.vlgmr.msra.gmra.mxu0 %vm476_vm0, %v1956_v47 }
 0x17f   : > { %1904 = vmatprep.mubr.msk.bf16.mxu0 %vm476_vm0, %v1957_v9 }
 0x181   : > { %v954_v34 = vpop.permute.xlu0 %953  ;;  %v959_v35 = vpop.permute.xlu1 %958 }
 0x185   : > { %v2335_v36 = vpop.permute.xlu0 %963  ;;  %v2337_v37 = vpop.permute.xlu1 %968 }
 0x186   : > { %1905 = vmatmul.mubr.msk.bf16.gmra.mxu0 %vm476_vm0, %v1958_v11 }
 0x187   : > { %1908 = vmatprep.mubr.msk.bf16.mxu0 %vm476_vm0, %v1959_v22 }
 0x189   : > { %v974_v38 = vpop.permute.xlu0 %973  ;;  %v2339_v39 = vpop.permute.xlu1 %978 }
 0x18d   : > { %v2341_v40 = vpop.permute.xlu0 %983  ;;  %v2343_v41 = vpop.permute.xlu1 %988 }
 0x18e   : > { %1909 = vmatmul.mubr.msk.bf16.gmra.mxu0 %vm476_vm0, %v1960_v23 }
 0x18f   : > { %1912 = vmatprep.mubr.msk.bf16.mxu0 %vm476_vm0, %v1961_v48 }
 0x191   : > { %v2345_v42 = vpop.permute.xlu0 %993  ;;  %v2347_v43 = vpop.permute.xlu1 %998 }
 0x195   : > { %v2349_v45 = vpop.permute.xlu0 %1003  ;;  %v2351_v47 = vpop.permute.xlu1 %1008 }
 0x196   : > { %1913 = vmatmul.mubr.msk.bf16.gmra.mxu0 %vm476_vm0, %v1962_v49 }
 0x199   : > { %v2353_v9 = vpop.permute.xlu0 %1013  ;;  %v2355_v22 = vpop.permute.xlu1 %1018 }
 0x19d   : > { %v1233_v48 = vpop.permute.xlu0 %1232  ;;  %v1238_v50 = vpop.permute.xlu1 %1237 }
 0x1b7   : > { %v1854_v51 = vpop.f32.mrf.mxu1 }
 0x1b9   : > { %v721_v52 = vpop.f32.mrf.mxu1 }
 0x1bb   : > { %v1855_v53 = vpop.f32.mrf.mxu1 }
 0x1bd   : > { %v724_v54 = vpop.f32.mrf.mxu1 }
 0x22a   : > { %v1862_v55 = vpop.f32.mrf.mxu1 }
 0x22b   : > { %v795_v58 = vadd.f32 %v1862_v55, %v1854_v51  ;;  %v1243_v51 = vpop.permute.xlu0 %1242 }
 0x22c   : > { %v786_v56 = vpop.f32.mrf.mxu1 }
 0x22d   : > { %v787_v62 = vadd.f32 %v786_v56, %v721_v52 }
 0x22e   : > { %v1863_v59 = vpop.f32.mrf.mxu1  ;;  %v1870_v60 = vpop.f32.mrf.mxu0 }
 0x22f   : > { %v873_v63 = vadd.f32 %v1870_v60, %v795_v58  ;;  %v798_v2 = vadd.f32 %v1863_v59, %v1855_v53  ;;  %v1248_v53 = vpop.permute.xlu1 %1247  ;;  %v1253_v55 = vpop.permute.xlu0 %1252 }
 0x230   : > { %v789_v0 = vpop.f32.mrf.mxu1  ;;  %v856_v1 = vpop.f32.mrf.mxu0 }
 0x231   : > { %v871_v3 = vadd.f32 %v856_v1, %v787_v62  ;;  %v901_v5 = vadd.f32 %v892_v57, %v873_v63  ;;  %v790_v6 = vadd.f32 %v789_v0, %v724_v54 }
 0x232   : > { %v1871_v4 = vpop.f32.mrf.mxu0 }
 0x233   : > { %v874_v7 = vadd.f32 %v1871_v4, %v798_v2  ;;  %v899_v12 = vadd.f32 %v882_v8, %v871_v3  ;;  %v905_v16 = vmax.f32 %v901_v5, 0.0  ;;  %v1258_v57 = vpop.permute.xlu1 %1257  ;;  %v1263_v59 = vpop.permute.xlu0 %1262 }
 0x234   : > { %v859_v10 = vpop.f32.mrf.mxu0 }
 0x235   : > { %v902_v13 = vadd.f32 %v897_v61, %v874_v7  ;;  %v872_v14 = vadd.f32 %v859_v10, %v790_v6  ;;  %v903_v19 = vmax.f32 %v899_v12, 0.0 }
 0x237   : > { %v906_v17 = vmax.f32 %v902_v13, 0.0  ;;  %v900_v18 = vadd.f32 %v887_v15, %v872_v14  ;;  %v1268_v3 = vpop.permute.xlu1 %1267  ;;  %v1273_v13 = vpop.permute.xlu0 %1272 }
 0x239   : > { %v904_v20 = vmax.f32 %v900_v18, 0.0  ;;  %v908_v21 = vpack.c.bf16 %v906_v17, %v905_v16 }
 0x23b   : > { %1872 = vmatprep.subr.bf16.mxu1 %v908_v21  ;;  %v907_v24 = vpack.c.bf16 %v904_v20, %v903_v19 }
 0x23c   : > { %1873 = vmatpush3.bf16.msra.mxu1 %v908_v21 }
 0x23d   : > { %1874 = vmatprep.subr.bf16.mxu1 %v907_v24 }
 0x23e   : > { %v1902_v44 = vpop.f32.mrf.mxu0 }
 0x23f   : > { %v1417_v63 = vadd.f32 %v1902_v44, %v1243_v51  ;;  %v1283_v44 = vpop.permute.xlu0 %1282 }
 0x240   : > { %1875 = vmatpush3.bf16.msra.mxu1 %v907_v24  ;;  %v1408_v46 = vpop.f32.mrf.mxu0 }
 0x241   : > { %v1409_v4 = vadd.f32 %v1408_v46, %v1233_v48 }
 0x242   : > { %v1903_v11 = vpop.f32.mrf.mxu0 }
 0x243   : > { %1877 = vmatmul.mubr.msk.bf16.vlgmr.msra.gmra.mxu1 %vm680_vm1, %v1964_v25  ;;  %v1420_v8 = vadd.f32 %v1903_v11, %v1248_v53 }
 0x244   : > { %1880 = vmatprep.mubr.msk.bf16.mxu1 %vm680_vm1, %v1965_v26  ;;  %v1411_v23 = vpop.f32.mrf.mxu0 }
 0x245   : > { %v1412_v18 = vadd.f32 %v1411_v23, %v1238_v50 }
 0x246   : > { %v1906_v49 = vpop.f32.mrf.mxu0 }
 0x247   : > { %v1433_v26 = vadd.f32 %v1906_v49, %v1263_v59 }
 0x248   : > { %v1424_v52 = vpop.f32.mrf.mxu0 }
 0x24a   : > { %v1907_v54 = vpop.f32.mrf.mxu0 }
 0x24b   : > { %1881 = vmatmul.mubr.msk.bf16.gmra.mxu1 %vm680_vm1, %v1966_v27  ;;  %v1436_v48 = vadd.f32 %v1907_v54, %v1268_v3 }
 0x24c   : > { %1884 = vmatprep.mubr.msk.bf16.mxu1 %vm680_vm1, %v1967_v28  ;;  %v1427_v56 = vpop.f32.mrf.mxu0 }
 0x24e   : > { %v1910_v61 = vpop.f32.mrf.mxu0 }
 0x250   : > { %v1440_v10 = vpop.f32.mrf.mxu0 }
 0x252   : > { %v1911_v27 = vpop.f32.mrf.mxu0 }
 0x253   : > { %1885 = vmatmul.mubr.msk.bf16.gmra.mxu1 %vm680_vm1, %v1968_v29  ;;  %v1278_v29 = vpop.permute.xlu1 %1277 }
 0x254   : > { %1888 = vmatprep.mubr.msk.bf16.mxu1 %vm680_vm1, %v1969_v30  ;;  %v1443_v49 = vpop.f32.mrf.mxu0 }
 0x257   : > { %v1288_v59 = vpop.permute.xlu1 %1287 }
 0x25b   : > { %1889 = vmatmul.mubr.msk.bf16.gmra.mxu1 %vm680_vm1, %v1970_v31 }
 0x303   : > { %v1878_v58 = vpop.f32.mrf.mxu1 }
 0x304   : > { %v1128_v60 = vadd.f32 %v1878_v58, %v954_v34  ;;  %v1425_v34 = vadd.f32 %v1424_v52, %v1253_v55  ;;  %v1428_v55 = vadd.f32 %v1427_v56, %v1258_v57 }
 0x305   : > { %v1119_v62 = vpop.f32.mrf.mxu1 }
 0x306   : > { %v1184_v0 = vmax.f32 %v1128_v60, 0.0  ;;  %v1120_v1 = vadd.f32 %v1119_v62, %v944_v32 }
 0x307   : > { %v1879_v2 = vpop.f32.mrf.mxu1 }
 0x308   : > { %v1473_v5 = vadd.f32 %v1417_v63, %v1184_v0  ;;  %v1182_v6 = vmax.f32 %v1120_v1, 0.0  ;;  %v1131_v7 = vadd.f32 %v1879_v2, %v959_v35  ;;  %v1449_v63 = vadd.f32 %v1910_v61, %v1283_v44  ;;  %v1914_v0 = vpop.f32.mrf.mxu0  ;;  %v1293_v2 = vpop.permute.xlu0 %1292 }
 0x309   : > { %v1122_v12 = vpop.f32.mrf.mxu1 }
 0x30a   : > { %v1764_v14 = vpack.c.bf16 %v1473_v5, %v1473_v5  ;;  %v1471_v15 = vadd.f32 %v1409_v4, %v1182_v6  ;;  %v1185_v16 = vmax.f32 %v1131_v7, 0.0  ;;  %v1123_v17 = vadd.f32 %v1122_v12, %v949_v33  ;;  %v1456_v12 = vpop.f32.mrf.mxu0 }
 0x30b   : > { %v1882_v19 = vpop.f32.mrf.mxu1  ;;  %v1441_v4 = vadd.f32 %v1440_v10, %v1273_v13  ;;  %v1444_v13 = vadd.f32 %v1443_v49, %v1278_v29 }
 0x30c   : > { %1554 = vst.msk [vmem:[%s2361_s29 + $0x8] sm:$0xf] %vm1551_vm4, %v1764_v14  ;;  %v1762_v20 = vpack.c.bf16 %v1471_v15, %v1471_v15  ;;  %v1474_v21 = vadd.f32 %v1420_v8, %v1185_v16  ;;  %v1183_v24 = vmax.f32 %v1123_v17, 0.0  ;;  %v1144_v25 = vadd.f32 %v1882_v19, %v974_v38  ;;  %v1298_v15 = vpop.permute.xlu1 %1297  ;;  %v1303_v19 = vpop.permute.xlu0 %1302 }
 0x30d   : > { %v1135_v28 = vpop.f32.mrf.mxu1  ;;  %v1452_v8 = vadd.f32 %v1911_v27, %v1288_v59 }
 0x30e   : > { %1552 = vst.msk [vmem:[%s2361_s29] sm:$0xf] %vm1551_vm4, %v1762_v20  ;;  %v1765_v30 = vpack.c.bf16 %v1474_v21, %v1474_v21  ;;  %v1472_v31 = vadd.f32 %v1412_v18, %v1183_v24  ;;  %v1188_v32 = vmax.f32 %v1144_v25, 0.0  ;;  %v1136_v33 = vadd.f32 %v1135_v28, %v2335_v36 }
 0x30f   : > { %v1883_v35 = vpop.f32.mrf.mxu1  ;;  %v1465_v25 = vadd.f32 %v1914_v0, %v1303_v19 }
 0x310   : > { %1555 = vst.msk [vmem:[%s2361_s29 + $0xc] sm:$0xf] %vm1551_vm4, %v1765_v30  ;;  %v1763_v46 = vpack.c.bf16 %v1472_v31, %v1472_v31  ;;  %v1477_v38 = vadd.f32 %v1433_v26, %v1188_v32  ;;  %v1186_v11 = vmax.f32 %v1136_v33, 0.0  ;;  %v1147_v23 = vadd.f32 %v1883_v35, %v2339_v39  ;;  %v1915_v26 = vpop.f32.mrf.mxu0  ;;  %v1308_v33 = vpop.permute.xlu1 %1307 }
 0x311   : > { %v1138_v50 = vpop.f32.mrf.mxu1  ;;  %v1457_v31 = vadd.f32 %v1456_v12, %v1293_v2 }
 0x312   : > { %1553 = vst.msk [vmem:[%s2361_s29 + $0x4] sm:$0xf] %vm1551_vm4, %v1763_v46  ;;  %v1768_v51 = vpack.c.bf16 %v1477_v38, %v1477_v38  ;;  %v1475_v53 = vadd.f32 %v1425_v34, %v1186_v11  ;;  %v1189_v36 = vmax.f32 %v1147_v23, 0.0  ;;  %v1139_v52 = vadd.f32 %v1138_v50, %v2337_v37  ;;  %v1459_v38 = vpop.f32.mrf.mxu0 }
 0x313   : > { %v1886_v58 = vpop.f32.mrf.mxu1  ;;  %v1468_v46 = vadd.f32 %v1915_v26, %v1308_v33  ;;  %v1460_v50 = vadd.f32 %v1459_v38, %v1298_v15 }
 0x314   : > { %1558 = vst.msk [vmem:[%s2361_s29 + $0x18] sm:$0xf] %vm1551_vm4, %v1768_v51  ;;  %v1766_v60 = vpack.c.bf16 %v1475_v53, %v1475_v53  ;;  %v1478_v62 = vadd.f32 %v1436_v48, %v1189_v36  ;;  %v1187_v39 = vmax.f32 %v1139_v52, 0.0  ;;  %v1160_v54 = vadd.f32 %v1886_v58, %v2345_v42 }
 0x315   : > { %v1151_v1 = vpop.f32.mrf.mxu1 }
 0x316   : > { %1556 = vst.msk [vmem:[%s2361_s29 + $0x10] sm:$0xf] %vm1551_vm4, %v1766_v60  ;;  %v1769_v3 = vpack.c.bf16 %v1478_v62, %v1478_v62  ;;  %v1476_v37 = vadd.f32 %v1428_v55, %v1187_v39  ;;  %v1192_v56 = vmax.f32 %v1160_v54, 0.0  ;;  %v1152_v57 = vadd.f32 %v1151_v1, %v2341_v40 }
 0x317   : > { %v1887_v5 = vpop.f32.mrf.mxu1 }
 0x318   : > { %1559 = vst.msk [vmem:[%s2361_s29 + $0x1c] sm:$0xf] %vm1551_vm4, %v1769_v3  ;;  %v1767_v6 = vpack.c.bf16 %v1476_v37, %v1476_v37  ;;  %v1481_v7 = vadd.f32 %v1449_v63, %v1192_v56  ;;  %v1190_v42 = vmax.f32 %v1152_v57, 0.0  ;;  %v1163_v61 = vadd.f32 %v1887_v5, %v2347_v43 }
 0x319   : > { %v1154_v14 = vpop.f32.mrf.mxu1 }
 0x31a   : > { %1557 = vst.msk [vmem:[%s2361_s29 + $0x14] sm:$0xf] %vm1551_vm4, %v1767_v6  ;;  %v1772_v16 = vpack.c.bf16 %v1481_v7, %v1481_v7  ;;  %v1479_v17 = vadd.f32 %v1441_v4, %v1190_v42  ;;  %v1193_v40 = vmax.f32 %v1163_v61, 0.0  ;;  %v1155_v10 = vadd.f32 %v1154_v14, %v2343_v41 }
 0x31b   : > { %v1890_v18 = vpop.f32.mrf.mxu1 }
 0x31c   : > { %1562 = vst.msk [vmem:[%s2361_s29 + $0x28] sm:$0xf] %vm1551_vm4, %v1772_v16  ;;  %v1770_v20 = vpack.c.bf16 %v1479_v17, %v1479_v17  ;;  %v1482_v43 = vadd.f32 %v1452_v8, %v1193_v40  ;;  %v1191_v21 = vmax.f32 %v1155_v10, 0.0  ;;  %v1176_v24 = vadd.f32 %v1890_v18, %v2353_v9 }
 0x31d   : > { %v1167_v27 = vpop.f32.mrf.mxu1 }
 0x31e   : > { %1560 = vst.msk [vmem:[%s2361_s29 + $0x20] sm:$0xf] %vm1551_vm4, %v1770_v20  ;;  %v1773_v28 = vpack.c.bf16 %v1482_v43, %v1482_v43  ;;  %v1480_v30 = vadd.f32 %v1444_v13, %v1191_v21  ;;  %v1196_v41 = vmax.f32 %v1176_v24, 0.0  ;;  %v1168_v29 = vadd.f32 %v1167_v27, %v2349_v45 }
 0x31f   : > { %v1891_v32 = vpop.f32.mrf.mxu1 }
 0x320   : > { %1563 = vst.msk [vmem:[%s2361_s29 + $0x2c] sm:$0xf] %vm1551_vm4, %v1773_v28  ;;  %v1771_v34 = vpack.c.bf16 %v1480_v30, %v1480_v30  ;;  %v1485_v35 = vadd.f32 %v1465_v25, %v1196_v41  ;;  %v1194_v9 = vmax.f32 %v1168_v29, 0.0  ;;  %v1179_v44 = vadd.f32 %v1891_v32, %v2355_v22 }
 0x321   : > { %v1170_v11 = vpop.f32.mrf.mxu1 }
 0x322   : > { %1561 = vst.msk [vmem:[%s2361_s29 + $0x24] sm:$0xf] %vm1551_vm4, %v1771_v34  ;;  %v1776_v45 = vpack.c.bf16 %v1485_v35, %v1485_v35  ;;  %v1483_v23 = vadd.f32 %v1457_v31, %v1194_v9  ;;  %v1197_v48 = vmax.f32 %v1179_v44, 0.0  ;;  %v1171_v49 = vadd.f32 %v1170_v11, %v2351_v47 }
 0x324   : > { %1566 = vst.msk [vmem:[%s2361_s29 + $0x38] sm:$0xf] %vm1551_vm4, %v1776_v45  ;;  %v1774_v51 = vpack.c.bf16 %v1483_v23, %v1483_v23  ;;  %v1486_v53 = vadd.f32 %v1468_v46, %v1197_v48  ;;  %v1195_v36 = vmax.f32 %v1171_v49, 0.0 }
 0x326   : > { %1564 = vst.msk [vmem:[%s2361_s29 + $0x30] sm:$0xf] %vm1551_vm4, %v1774_v51  ;;  %v1777_v22 = vpack.c.bf16 %v1486_v53, %v1486_v53  ;;  %v1484_v52 = vadd.f32 %v1460_v50, %v1195_v36 }
 0x328   : > { %1567 = vst.msk [vmem:[%s2361_s29 + $0x3c] sm:$0xf] %vm1551_vm4, %v1777_v22  ;;  %v1775_v55 = vpack.c.bf16 %v1484_v52, %v1484_v52 }
 0x32a   : > { %1565 = vst.msk [vmem:[%s2361_s29 + $0x34] sm:$0xf] %vm1551_vm4, %v1775_v55 }
 0x32b PF: > { %s20_s15 = sadd.s32 1, %s1993_s15   ;;  %s2426_s13 = smov %s1989_s14 }
 0x32c   : > { %p17_p5 = scmp.ge.s32.totalorder %s20_s15, 4   ;;  %s2427_s14 = smov %s2429_s16 }
 0x32e   :  { %19 = sbr.rel (!%p17_p5) target bundleno = 2 (0x2), region = 95 }

</bundles_post_ra>
